<compile_context>
chip_gen: v5e
topology: v5e:2x2
jax: 0.10.0
libtpu: 0.0.40
codegen_flags: <defaults>
</compile_context>

<pallas_src>
import functools

import jax
import jax.numpy as jnp
from jax import lax
from jax.experimental import pallas as pl
from jax.experimental.pallas import tpu as pltpu


def _ordloss_kernel(logits_ref, y_ref, out_ref, *, start, stop, n_bins):
    t = pl.program_id(2)  # pixel-tile index within the chunk (reduction axis)

    @pl.when(t == 0)
    def _():
        out_ref[...] = jnp.zeros_like(out_ref)

    logits = logits_ref[...].astype(jnp.float32)   # (C, TP); bf16 inputs cast after load
    y = y_ref[...].astype(jnp.float32)             # (1, TP)
    C, TP = logits.shape
    step = (stop - start) / (n_bins - 1)
    inv_step = 1.0 / step

    # --- digitize (np.digitize(y, bins, right=False)) done arithmetically on (1, TP):
    #     label = clip(floor((y - start)/step) + 1, 0, n_bins - 1)
    # Replaces the (C-1, TP) edge iota + compare chain + one cross-sublane reduction.
    labels = jnp.clip(jnp.floor((y - start) * inv_step) + 1.0, 0.0, float(n_bins - 1))

    # Single channel-index iota, reused for the one-hot gather and the expectation.
    cf = lax.broadcasted_iota(jnp.int32, (C, TP), 0).astype(jnp.float32)   # (C, TP)

    # --- stable log-softmax over the channel (sublane) axis ---
    m = jnp.max(logits, axis=0, keepdims=True)          # (1, TP)  [XLU]
    z = logits - m                                       # (C, TP)
    e = jnp.exp(z)                                       # (C, TP)  [EUP]
    s = jnp.sum(e, axis=0, keepdims=True)                # (1, TP)  [XLU]
    lse = jnp.log(s)                                     # (1, TP)  [EUP]

    # --- cross entropy per pixel: lse - z[label]  (gather via one-hot) ---
    onehot = (cf == labels).astype(jnp.float32)                    # (C, TP)
    z_at_label = jnp.sum(z * onehot, axis=0, keepdims=True)        # (1, TP)  [XLU]
    ce_pix = lse - z_at_label

    # --- ordinal expectation: tbins[c] = start + c*step, so
    #     y_hat = sum_c p_c * tbins_c = start + step * sum_c(c * e_c) / s
    num = jnp.sum(cf * e, axis=0, keepdims=True)                   # (1, TP)  [XLU]
    inv_s = pl.reciprocal(s, approx=True)                          # EUP slot (near free)
    inv_s = inv_s * (2.0 - s * inv_s)                              # 1 Newton step -> ~f32 exact
    y_hat = start + step * (num * inv_s)
    mae_pix = jnp.abs(y_hat - y)

    # Lane-dense accumulation into the resident per-(batch, chunk) output slab.
    out_ref[...] = out_ref[...] + ce_pix + mae_pix
    # TODO(synk): if profiling shows the 4 remaining XLU reductions binding on v6e/v7x,
    # fold the two static-weight sums (s, num) into one (2, C) @ (C, TP) MXU matmul.


def _tpu_vmem_bytes(default=64 << 20):
    """Physical per-core VMEM if discoverable (v5e/v6e: 128 MiB, v7x: 64 MiB)."""
    try:
        return int(getattr(pltpu.get_tpu_info(), "vmem_capacity_bytes", default))
    except Exception:
        return default


@functools.partial(jax.jit, static_argnames=("start", "stop", "n_bins", "tile_hw"))
def ord_loss(yd_hat, y, *, start, stop, n_bins, tile_hw=None):
    """Pallas implementation of OrdLoss.forward.

    yd_hat: (N, n_bins, H, W) float32 (or bfloat16) logits, NCHW
    y     : (N, 1, H, W)      float32 target intensities
    """
    N, C, H, W = yd_hat.shape
    assert C == n_bins
    assert n_bins >= 2, "n_bins must be >= 2 (step = (stop-start)/(n_bins-1))"
    assert float(stop) > float(start)
    HW = H * W

    # ---- generation-aware tile size / VMEM budget --------------------------------
    vmem = _tpu_vmem_bytes()
    if vmem >= (128 << 20):          # v5e / v6e: 128 MiB physical VMEM
        gen_cap, vmem_limit = 65536, 96 << 20
    else:                            # v7x: 64 MiB per TensorCore
        gen_cap, vmem_limit = 32768, 48 << 20
    # ~VMEM bytes per tile pixel: double-buffered (C+1)-row f32 inputs, the resident
    # output slab, and ~6 compiler-materialized (C, tile) f32 temporaries.
    bytes_per_pixel = 4 * (8 * C + 3)
    budget_cap = max(128, ((int(0.6 * vmem_limit) // bytes_per_pixel) // 128) * 128)
    if tile_hw is None:
        tile_hw = min(gen_cap, budget_cap)
    tile_hw = min(int(tile_hw), HW)
    # Block-shape legality: last dim must be a multiple of 128 (or the full HW) and divide HW.
    if HW % tile_hw != 0 or (tile_hw % 128 != 0 and tile_hw != HW):
        t = (tile_hw // 128) * 128
        while t >= 128 and HW % t != 0:
            t -= 128
        tile_hw = t if t >= 128 else HW   # fall back to one full-row tile
    T = HW // tile_hw

    # v7x megacore coverage when the batch axis alone can't split evenly across 2 cores.
    n_chunks = 2 if (N % 2 == 1 and T % 2 == 0) else 1
    T_in = T // n_chunks

    # Free reshapes (no HBM copy, no transpose): NCHW -> (N, C, HW) / (N, 1, HW).
    logits = yd_hat.reshape(N, C, HW)
    yf = y.reshape(N, 1, HW).astype(jnp.float32)

    kernel = functools.partial(_ordloss_kernel,
                               start=float(start), stop=float(stop), n_bins=n_bins)

    # Per-(batch, chunk) lane-dense partial sums; final tiny reduction done in XLA.
    partial_sums = pl.pallas_call(
        kernel,
        out_shape=jax.ShapeDtypeStruct((N * n_chunks, 1, tile_hw), jnp.float32),
        grid_spec=pltpu.PrefetchScalarGridSpec(
            num_scalar_prefetch=0,
            grid=(N, n_chunks, T_in),
            in_specs=[
                pl.BlockSpec((None, C, tile_hw), lambda n, p, t: (n, 0, p * T_in + t)),
                pl.BlockSpec((None, 1, tile_hw), lambda n, p, t: (n, 0, p * T_in + t)),
            ],
            out_specs=pl.BlockSpec((None, 1, tile_hw),
                                   lambda n, p, t: (n * n_chunks + p, 0, 0)),
        ),
        compiler_params=pltpu.CompilerParams(
            dimension_semantics=("parallel", "parallel", "arbitrary"),
            vmem_limit_bytes=vmem_limit),
    )(logits, yf)

    # Both CrossEntropyLoss and L1Loss use mean reduction over all N*H*W pixels.
    return jnp.sum(partial_sums) / (N * HW)


def _ord_loss_ref(yd_hat, y, *, start, stop, n_bins):
    """Pure-JAX reference mirroring the torch module, for correctness checking."""
    step = (stop - start) / (n_bins - 1)
    bins = start + step * jnp.arange(n_bins - 1, dtype=jnp.float32)    # digitize edges
    tbins = start + step * jnp.arange(n_bins, dtype=jnp.float32)       # bin values
    labels = jnp.sum(y >= bins[None, :, None, None], axis=1)           # (N, H, W) int
    logp = jax.nn.log_softmax(yd_hat.astype(jnp.float32), axis=1)
    ce = -jnp.mean(jnp.take_along_axis(logp, labels[:, None], axis=1))
    p = jax.nn.softmax(yd_hat.astype(jnp.float32), axis=1)
    y_hat = jnp.sum(p * tbins[None, :, None, None], axis=1, keepdims=True)
    mae = jnp.mean(jnp.abs(y_hat - y))
    return ce + mae


if __name__ == "__main__":
    start, stop, n_bins = 0, 1, 8
    N, H, W = 2, 16, 16

    key = jax.random.PRNGKey(0)
    k1, k2 = jax.random.split(key)
    yd_hat = jax.random.normal(k1, (N, n_bins, H, W), dtype=jnp.float32)
    y = jax.random.uniform(k2, (N, 1, H, W), dtype=jnp.float32,
                           minval=float(start), maxval=float(stop))

    loss = ord_loss(yd_hat, y, start=start, stop=stop, n_bins=n_bins)
    jax.block_until_ready(loss)

    ref = _ord_loss_ref(yd_hat, y, start=start, stop=stop, n_bins=n_bins)
    assert jnp.allclose(loss, ref, rtol=1e-4, atol=1e-5), (loss, ref)

    print("KERNEL_OK")
</pallas_src>

<mosaic_0001>
module attributes {stable_mosaic.version = 11 : i64} {
  func.func @_ordloss_kernel(%arg0: i32, %arg1: i32, %arg2: i32, %arg3: memref<1x8x256xf32, #tpu.memory_space<vmem>>, %arg4: memref<1x1x256xf32, #tpu.memory_space<vmem>>, %arg5: memref<1x1x256xf32, #tpu.memory_space<vmem>>) attributes {dimension_semantics = [#tpu.dimension_semantics<parallel>, #tpu.dimension_semantics<parallel>, #tpu.dimension_semantics<arbitrary>], iteration_bounds = array<i64: 2, 1, 1>, scalar_prefetch = 0 : i64, scratch_operands = 0 : i64, tpu.core_type = #tpu.core_type<tc>, window_params = [{transform_indices = @transform_0, window_bounds = array<i64: 1, 8, 256>}, {transform_indices = @transform_1, window_bounds = array<i64: 1, 1, 256>}, {transform_indices = @transform_2, window_bounds = array<i64: 1, 1, 256>}]} {
    %c0_i32 = arith.constant 0 : i32
    %0 = arith.cmpi eq, %arg2, %c0_i32 : i32
    %1 = arith.extui %0 : i1 to i32
    %c0_i32_0 = arith.constant 0 : i32
    %2 = arith.cmpi ne, %1, %c0_i32_0 : i32
    scf.if %2 {
      %cst_23 = arith.constant 0.000000e+00 : f32
      %58 = vector.broadcast %cst_23 : f32 to vector<1x256xf32>
      %c0_24 = arith.constant 0 : index
      %c0_25 = arith.constant 0 : index
      %c0_26 = arith.constant 0 : index
      %59 = vector.load %arg5[%c0_24, %c0_25, %c0_26] : memref<1x1x256xf32, #tpu.memory_space<vmem>>, vector<1x1x256xf32>
      %60 = vector.shape_cast %59 : vector<1x1x256xf32> to vector<1x256xf32>
      %61 = vector.shape_cast %58 : vector<1x256xf32> to vector<1x1x256xf32>
      tpu.vector_store %arg5[%c0_24, %c0_25, %c0_26], %61 {strides = array<i32>} : memref<1x1x256xf32, #tpu.memory_space<vmem>>, vector<1x1x256xf32>,
    } else {
    }
    %c0 = arith.constant 0 : index
    %c0_1 = arith.constant 0 : index
    %c0_2 = arith.constant 0 : index
    %3 = vector.load %arg3[%c0, %c0_1, %c0_2] : memref<1x8x256xf32, #tpu.memory_space<vmem>>, vector<1x8x256xf32>
    %4 = vector.shape_cast %3 : vector<1x8x256xf32> to vector<8x256xf32>
    %c0_3 = arith.constant 0 : index
    %c0_4 = arith.constant 0 : index
    %c0_5 = arith.constant 0 : index
    %5 = vector.load %arg4[%c0_3, %c0_4, %c0_5] : memref<1x1x256xf32, #tpu.memory_space<vmem>>, vector<1x1x256xf32>
    %6 = vector.shape_cast %5 : vector<1x1x256xf32> to vector<1x256xf32>
    %cst = arith.constant 0.000000e+00 : f32
    %7 = vector.broadcast %cst : f32 to vector<1x256xf32>
    %8 = arith.subf %6, %7 : vector<1x256xf32>
    %cst_6 = arith.constant 7.000000e+00 : f32
    %9 = vector.broadcast %cst_6 : f32 to vector<1x256xf32>
    %10 = arith.mulf %8, %9 : vector<1x256xf32>
    %11 = math.floor %10 : vector<1x256xf32>
    %cst_7 = arith.constant 1.000000e+00 : f32
    %12 = vector.broadcast %cst_7 : f32 to vector<1x256xf32>
    %13 = arith.addf %11, %12 : vector<1x256xf32>
    %cst_8 = arith.constant 0.000000e+00 : f32
    %cst_9 = arith.constant 7.000000e+00 : f32
    %14 = vector.broadcast %cst_8 : f32 to vector<1x256xf32>
    %15 = arith.maximumf %14, %13 : vector<1x256xf32>
    %16 = vector.broadcast %cst_9 : f32 to vector<1x256xf32>
    %17 = arith.minimumf %16, %15 : vector<1x256xf32>
    %18 = tpu.iota {dimensions = array<i32: 0>} : vector<8x256xi32>
    %19 = arith.sitofp %18 : vector<8x256xi32> to vector<8x256xf32>
    %cst_10 = arith.constant dense<0xFF800000> : vector<256xf32>
    %20 = vector.multi_reduction <maximumf>, %4, %cst_10 [0] : vector<8x256xf32> to vector<256xf32>
    %21 = vector.shape_cast %20 : vector<256xf32> to vector<1x256xf32>
    %22 = vector.broadcast %21 : vector<1x256xf32> to vector<8x256xf32>
    %23 = arith.subf %4, %22 : vector<8x256xf32>
    %24 = math.exp %23 : vector<8x256xf32>
    %cst_11 = arith.constant dense<0.000000e+00> : vector<256xf32>
    %25 = vector.multi_reduction <add>, %24, %cst_11 [0] : vector<8x256xf32> to vector<256xf32>
    %26 = vector.shape_cast %25 : vector<256xf32> to vector<1x256xf32>
    %27 = math.log %26 : vector<1x256xf32>
    %28 = vector.broadcast %17 : vector<1x256xf32> to vector<8x256xf32>
    %29 = arith.cmpf oeq, %19, %28 : vector<8x256xf32>
    %30 = arith.extui %29 : vector<8x256xi1> to vector<8x256xi32>
    %31 = arith.sitofp %30 : vector<8x256xi32> to vector<8x256xf32>
    %32 = arith.mulf %23, %31 : vector<8x256xf32>
    %cst_12 = arith.constant dense<0.000000e+00> : vector<256xf32>
    %33 = vector.multi_reduction <add>, %32, %cst_12 [0] : vector<8x256xf32> to vector<256xf32>
    %34 = vector.shape_cast %33 : vector<256xf32> to vector<1x256xf32>
    %35 = arith.subf %27, %34 : vector<1x256xf32>
    %36 = arith.mulf %19, %24 : vector<8x256xf32>
    %cst_13 = arith.constant dense<0.000000e+00> : vector<256xf32>
    %37 = vector.multi_reduction <add>, %36, %cst_13 [0] : vector<8x256xf32> to vector<256xf32>
    %38 = vector.shape_cast %37 : vector<256xf32> to vector<1x256xf32>
    %39 = tpu.reciprocal %26 {approx = true} : vector<1x256xf32> -> vector<1x256xf32>
    %40 = arith.mulf %26, %39 : vector<1x256xf32>
    %cst_14 = arith.constant 2.000000e+00 : f32
    %41 = vector.broadcast %cst_14 : f32 to vector<1x256xf32>
    %42 = arith.subf %41, %40 : vector<1x256xf32>
    %43 = arith.mulf %39, %42 : vector<1x256xf32>
    %44 = arith.mulf %38, %43 : vector<1x256xf32>
    %cst_15 = arith.constant 0.142857149 : f32
    %45 = vector.broadcast %cst_15 : f32 to vector<1x256xf32>
    %46 = arith.mulf %45, %44 : vector<1x256xf32>
    %cst_16 = arith.constant 0.000000e+00 : f32
    %47 = vector.broadcast %cst_16 : f32 to vector<1x256xf32>
    %48 = arith.addf %47, %46 : vector<1x256xf32>
    %49 = arith.subf %48, %6 : vector<1x256xf32>
    %50 = math.absf %49 : vector<1x256xf32>
    %c0_17 = arith.constant 0 : index
    %c0_18 = arith.constant 0 : index
    %c0_19 = arith.constant 0 : index
    %51 = vector.load %arg5[%c0_17, %c0_18, %c0_19] : memref<1x1x256xf32, #tpu.memory_space<vmem>>, vector<1x1x256xf32>
    %52 = vector.shape_cast %51 : vector<1x1x256xf32> to vector<1x256xf32>
    %53 = arith.addf %52, %35 : vector<1x256xf32>
    %54 = arith.addf %53, %50 : vector<1x256xf32>
    %c0_20 = arith.constant 0 : index
    %c0_21 = arith.constant 0 : index
    %c0_22 = arith.constant 0 : index
    %55 = vector.load %arg5[%c0_20, %c0_21, %c0_22] : memref<1x1x256xf32, #tpu.memory_space<vmem>>, vector<1x1x256xf32>
    %56 = vector.shape_cast %55 : vector<1x1x256xf32> to vector<1x256xf32>
    %57 = vector.shape_cast %54 : vector<1x256xf32> to vector<1x1x256xf32>
    tpu.vector_store %arg5[%c0_20, %c0_21, %c0_22], %57 {strides = array<i32>} : memref<1x1x256xf32, #tpu.memory_space<vmem>>, vector<1x1x256xf32>,
    return
  }
  func.func @transform_0(%arg0: i32, %arg1: i32, %arg2: i32) -> (i32, i32, i32) {
    %c1_i32 = arith.constant 1 : i32
    %0 = arith.muli %arg1, %c1_i32 : i32
    %1 = arith.addi %0, %arg2 : i32
    %c0_i32 = arith.constant 0 : i32
    %c0_i32_0 = arith.constant 0 : i32
    return %arg0, %c0_i32, %1 : i32, i32, i32
  }
  func.func @transform_1(%arg0: i32, %arg1: i32, %arg2: i32) -> (i32, i32, i32) {
    %c1_i32 = arith.constant 1 : i32
    %0 = arith.muli %arg1, %c1_i32 : i32
    %1 = arith.addi %0, %arg2 : i32
    %c0_i32 = arith.constant 0 : i32
    %c0_i32_0 = arith.constant 0 : i32
    return %arg0, %c0_i32, %1 : i32, i32, i32
  }
  func.func @transform_2(%arg0: i32, %arg1: i32, %arg2: i32) -> (i32, i32, i32) {
    %c1_i32 = arith.constant 1 : i32
    %0 = arith.muli %arg0, %c1_i32 : i32
    %1 = arith.addi %0, %arg1 : i32
    %c0_i32 = arith.constant 0 : i32
    %c0_i32_0 = arith.constant 0 : i32
    %c0_i32_1 = arith.constant 0 : i32
    return %1, %c0_i32, %c0_i32_0 : i32, i32, i32
  }
}

</mosaic_0001>

<bundles_post_ra>
// kernel: ord_loss.1
= control target key start
LH: loop header
LB: loop body
LE: loop exit
PB: predicated region body
PF: predicated region fallthrough
CT: control target
= control target key end

     0   :  { %s546_s9 = smov 0   ;;  %s548_s10 = smov 0   ;;  %s600_s0 = inlined_call_operand.vmem [shape: f32[2,8,256], index: 0, kind: input, shape index: {}]   ;;  %s601_s1 = inlined_call_operand.vmem [shape: f32[2,1,256], index: 1, kind: input, shape index: {}]   ;;  %s602_s2 = inlined_call_operand.vmem [shape: f32[2,1,256], index: 2, kind: output, shape index: {}]  }
   0x1   :  { %s550_s11 = smov 0  }
   0x2 LB: > { %s31_s12 = sadd.s32 1, %s524_s10  ;;  %p459_p0 = scmp.ge.s32.totalorder %s528_s11, 1  ;;  %s528_s11 = sphi %s550_s11, %s12_s11   ;;  %s524_s10 = sphi %s548_s10, %s606_s10   ;;  %s520_s9 = sphi %s546_s9, %s605_s9  }
   0x3   : > { %p33_p1 = scmp.ge.s32.totalorder %s31_s12, 2  ;;  %p164_p2 = scmp.lt.s32.totalorder %s528_s11, 3 }
   0x5   : > { %s608_s12 = smov (%p33_p1, %s31_s12), 0  ;;  %p165_p3 = pnand %p459_p0, %p164_p2 }
   0x6   : > { %p202_p4 = scmp.lt.s32.totalorder (!%p165_p3), %s520_s9, 1 }
   0x7   : > { %168 = sbr.rel (%p165_p3) target bundleno = 81 (0x51), region = 28 }
   0xc   : > { %s610_s9 = smov (!%p202_p4, %s520_s9), 1  ;;  %v233_v0 = vlaneseq  ;;  %v530_v5 = vmov 0.0   ;;  %vm351_vm3 = vcmask 1040384  }
   0xd   : > { %s468_s13 = sshll.u32 %s610_s9, 4  ;;  %s462_s14 = sshll.u32 %s610_s9, 1 }
   0xe   : > { %vm564_vm0 = vcmp.lt.s32.totalorder %v233_v0, 256  ;;  %s209_s17 = scalar_lea.vmem %s600_s0, %s468_s13  ;;  %s220_s20 = scalar_lea.vmem %s601_s1, %s462_s14  ;;  %v247_v18 = vshrl.u32 %v233_v0, 7 }
   0xf   : > { %s577_s23 = scalar_lea.vmem %s602_s2, %s462_s14  ;;  %v238_v2 = vld [vmem:[%s209_s17] sm:$0xff]  ;;  %v239_v3 = vld [vmem:[%s209_s17 + $0x8] sm:$0xff] }
  0x10   : > { %v579_v4 = vld [vmem:[%s220_s20] sm:$0x3]  ;;  %237 = vst.msk [vmem:[%s577_s23] sm:$0x3] %vm564_vm0, %v530_v5  ;;  %v249_v7 = vrot.slane %v238_v2, 4  ;;  %v255_v8 = vrot.slane %v239_v3, 4  ;;  %v248_v25 = vcvt.s32.f32 %v247_v18 }
  0x11   : > { %v241_v6 = vmul.f32 7.0, %v579_v4 }
  0x12   : > { %v250_v10 = vmax.f32 %v238_v2, %v249_v7  ;;  %v256_v11 = vmax.f32 %v239_v3, %v255_v8 }
  0x13   : > { %v242_v9 = vfloor.f32 %v241_v6 }
  0x14   : > { %v251_v13 = vrot.slane %v250_v10, 2  ;;  %v257_v14 = vrot.slane %v256_v11, 2 }
  0x15   : > { %v243_v12 = vadd.f32 1.0, %v242_v9 }
  0x16   : > { %v252_v16 = vmax.f32 %v250_v10, %v251_v13  ;;  %v258_v17 = vmax.f32 %v256_v11, %v257_v14 }
  0x17   : > { %v244_v15 = vmax.f32 %v243_v12, 0.0 }
  0x18   : > { %v253_v20 = vrot.slane %v252_v16, 1  ;;  %v259_v21 = vrot.slane %v258_v17, 1 }
  0x19   : > { %v245_v19 = vmin.f32 %v244_v15, 7.0 }
  0x1a   : > { %v254_v22 = vmax.f32 %v252_v16, %v253_v20  ;;  %v260_v23 = vmax.f32 %v258_v17, %v259_v21 }
  0x1b   : > { %v285_v24 = vperm.slane %v245_v19, 1  ;;  %v284_v28 = vperm.slane %v245_v19, 0 }
  0x1c   : > { %v261_v26 = vsub.f32 %v238_v2, %v254_v22  ;;  %v262_v27 = vsub.f32 %v239_v3, %v260_v23 }
  0x1d   : > { %vm289_vm1 = vcmp.eq.f32.partialorder %v248_v25, %v285_v24  ;;  %vm288_vm2 = vcmp.eq.f32.partialorder %v248_v25, %v284_v28 }
  0x1e   : > { %v263_v29 = vmul.f32 1.442695, %v261_v26  ;;  %v265_v30 = vmul.f32 1.442695, %v262_v27  ;;  %v465_v31 = vsel %vm289_vm1, 1.0, %v530_v5  ;;  %v464_v32 = vsel %vm288_vm2, 1.0, %v530_v5 }
  0x1f   : > { %v295_v33 = vmul.f32 %v465_v31, %v262_v27  ;;  %v294_v35 = vmul.f32 %v464_v32, %v261_v26  ;;  %v339_v27 = vperm.slane %v579_v4, 0 }
  0x20   : > { %494 = vpow2.f32 %v263_v29 }
  0x21   : > { %496 = vpow2.f32 %v265_v30  ;;  %v302_v38 = vrot.slane %v295_v33, 4  ;;  %v296_v44 = vrot.slane %v294_v35, 4  ;;  %v340_v30 = vperm.slane %v579_v4, 1 }
  0x23   : > { %v303_v47 = vadd.f32 %v302_v38, %v295_v33  ;;  %v297_v52 = vadd.f32 %v296_v44, %v294_v35 }
  0x25   : > { %v304_v55 = vrot.slane %v303_v47, 2  ;;  %v298_v60 = vrot.slane %v297_v52, 2 }
  0x26   : > { %v495_v34 = vpop.eup %494 }
  0x27   : > { %v497_v36 = vpop.eup %496  ;;  %v267_v37 = vrot.slane %v495_v34, 4  ;;  %v310_v39 = vmul.f32 %v495_v34, %v248_v25  ;;  %v305_v62 = vadd.f32 %v304_v55, %v303_v47  ;;  %v299_v0 = vadd.f32 %v298_v60, %v297_v52 }
  0x28   : > { %v273_v40 = vrot.slane %v497_v36, 4  ;;  %v311_v41 = vmul.f32 %v497_v36, %v248_v25 }
  0x29   : > { %v268_v42 = vadd.f32 %v495_v34, %v267_v37  ;;  %v312_v45 = vrot.slane %v310_v39, 4  ;;  %v306_v3 = vrot.slane %v305_v62, 1  ;;  %v300_v8 = vrot.slane %v299_v0, 1 }
  0x2a   : > { %v274_v43 = vadd.f32 %v497_v36, %v273_v40  ;;  %v318_v48 = vrot.slane %v311_v41, 4  ;;  %v347_v36 = vld [vmem:[%s577_s23] sm:$0x3] }
  0x2b   : > { %v269_v46 = vrot.slane %v268_v42, 2  ;;  %v313_v53 = vadd.f32 %v312_v45, %v310_v39  ;;  %v307_v12 = vadd.f32 %v306_v3, %v305_v62  ;;  %v301_v17 = vadd.f32 %v300_v8, %v299_v0 }
  0x2c   : > { %v275_v49 = vrot.slane %v274_v43, 2  ;;  %v319_v56 = vadd.f32 %v318_v48, %v311_v41 }
  0x2d   : > { %v270_v50 = vadd.f32 %v269_v46, %v268_v42  ;;  %v314_v61 = vrot.slane %v313_v53, 2 }
  0x2e   : > { %v276_v51 = vadd.f32 %v275_v49, %v274_v43  ;;  %v320_v63 = vrot.slane %v319_v56, 2 }
  0x2f   : > { %v271_v54 = vrot.slane %v270_v50, 1  ;;  %v315_v2 = vadd.f32 %v314_v61, %v313_v53 }
  0x30   : > { %v277_v57 = vrot.slane %v276_v51, 1  ;;  %v321_v5 = vadd.f32 %v320_v63, %v319_v56 }
  0x31   : > { %v272_v58 = vadd.f32 %v271_v54, %v270_v50  ;;  %v316_v9 = vrot.slane %v315_v2, 1 }
  0x32   : > { %v278_v59 = vadd.f32 %v277_v57, %v276_v51  ;;  %v322_v13 = vrot.slane %v321_v5, 1 }
  0x33   : > { %498 = vlog2.f32 %v272_v58  ;;  %v317_v18 = vadd.f32 %v316_v9, %v315_v2 }
  0x34   : > { %500 = vlog2.f32 %v278_v59  ;;  %v323_v22 = vadd.f32 %v322_v13, %v321_v5 }
  0x35   : > { %502 = vrcp.f32 %v272_v58 }
  0x36   : > { %504 = vrcp.f32 %v278_v59 }
  0x39   : > { %v499_v6 = vpop.eup %498 }
  0x3a   : > { %v501_v7 = vpop.eup %500  ;;  %v280_v20 = vmul.f32 0.6931472, %v499_v6 }
  0x3b   : > { %v503_v10 = vpop.eup %502  ;;  %v282_v11 = vmul.f32 0.6931472, %v501_v7 }
  0x3c   : > { %v505_v14 = vpop.eup %504  ;;  %v326_v15 = vmul.f32 %v503_v10, %v272_v58  ;;  %v308_v28 = vsub.f32 %v280_v20, %v301_v17 }
  0x3d   : > { %v327_v16 = vmul.f32 %v505_v14, %v278_v59  ;;  %v309_v21 = vsub.f32 %v282_v11, %v307_v12 }
  0x3e   : > { %v328_v19 = vsub.f32 2.0, %v326_v15 }
  0x3f   : > { %v329_v23 = vsub.f32 2.0, %v327_v16  ;;  %v350_v31 = vrot.slane %v309_v21, 7 }
  0x40   : > { %v330_v24 = vmul.f32 %v503_v10, %v328_v19 }
  0x41   : > { %v331_v25 = vmul.f32 %v505_v14, %v329_v23  ;;  %v352_v37 = vsel %vm351_vm3, %v308_v28, %v350_v31 }
  0x42   : > { %v332_v26 = vmul.f32 %v330_v24, %v317_v18  ;;  %v354_v40 = vadd.f32 %v352_v37, %v347_v36 }
  0x43   : > { %v333_v29 = vmul.f32 %v331_v25, %v323_v22 }
  0x44   : > { %v334_v32 = vmul.f32 0.14285715, %v332_v26 }
  0x45   : > { %v335_v33 = vmul.f32 0.14285715, %v333_v29 }
  0x46   : > { %v343_v34 = vsub.f32 %v334_v32, %v339_v27 }
  0x47   : > { %v344_v35 = vsub.f32 %v335_v33, %v340_v30 }
  0x48   : > { %v345_v38 = vand.u32 2147483647, %v343_v34 }
  0x49   : > { %v346_v39 = vand.u32 2147483647, %v344_v35 }
  0x4b   : > { %v357_v41 = vrot.slane %v346_v39, 7 }
  0x4d   : > { %v358_v42 = vsel %vm351_vm3, %v345_v38, %v357_v41 }
  0x4e   : > { %v360_v43 = vadd.f32 %v358_v42, %v354_v40 }
  0x50   : > { %365 = vst.msk [vmem:[%s577_s23] sm:$0x3] %vm564_vm0, %v360_v43 }
  0x51 PF: > { %s12_s11 = sadd.s32 1, %s528_s11   ;;  %s605_s9 = smov %s524_s10 }
  0x52   : > { %p9_p5 = scmp.ge.s32.totalorder %s12_s11, 4   ;;  %s606_s10 = smov %s608_s12 }
  0x54   :  { %11 = sbr.rel (!%p9_p5) target bundleno = 2 (0x2), region = 65 }

</bundles_post_ra>
